<compile_context>
chip_gen: v7x
topology: tpu7x:2x2x1
jax: 0.10.0
libtpu: 0.0.40
codegen_flags: <defaults>
</compile_context>

<pallas_src>
import jax
import jax.numpy as jnp
from jax.experimental import pallas as pl
from jax.experimental.pallas import tpu as pltpu


def _round_up(x, m):
    return ((x + m - 1) // m) * m


def _are_loss_kernel(pred_ref, target_ref, row_loss_ref):
    # pred_ref/target_ref: (tm, C) tiles;  row_loss_ref: (tm, 1)
    x = pred_ref[...].astype(jnp.float32)
    t = target_ref[...].astype(jnp.float32)

    # numerically stable log_softmax along the class (lane) axis
    m = jnp.max(x, axis=1, keepdims=True)
    shifted = x - m
    lse = jnp.log(jnp.sum(jnp.exp(shifted), axis=1, keepdims=True))
    logp = shifted - lse                                   # (tm, C)

    # per-row cross-entropy-style term (keepdims -> stays 2-D)
    row_loss_ref[...] = jnp.sum(-t * logp, axis=1, keepdims=True)


def are_loss(pred, target, *, tm=None):
    """loss = mean(sum(-target * log_softmax(pred, axis=1), axis=1))."""
    assert pred.shape == target.shape and pred.ndim == 2
    B, C = pred.shape
    itemsize = jnp.dtype(pred.dtype).itemsize
    # sublane granularity: 8 rows for 32-bit, 16 for 16-bit (packed) dtypes
    sub = 8 if itemsize >= 4 else 16

    if tm is None:
        # Bandwidth-bound: aim for ~1 MiB per input tile so
        # 2 inputs x 2 pipeline buffers + f32 intermediates stay well under the
        # scoped-VMEM defaults on every generation (16 MiB v5e, 32 MiB v6e/v7x),
        # while tiles stay large enough to amortize the ~0.35 us per-step cost.
        tile_bytes = 1 * 1024 * 1024
        tm = tile_bytes // max(1, C * itemsize)
        tm = max(sub, (tm // sub) * sub)

    # never make the tile larger than the (rounded-up) batch
    tm = min(tm, _round_up(B, sub))
    tm = max(sub, (tm // sub) * sub)

    # pad batch so every tile is full; padded rows (target == 0) contribute 0
    B_pad = _round_up(B, tm)
    if B_pad != B:
        pad = B_pad - B
        pred = jnp.pad(pred, ((0, pad), (0, 0)))
        target = jnp.pad(target, ((0, pad), (0, 0)))

    grid = B_pad // tm

    row_losses = pl.pallas_call(
        _are_loss_kernel,
        out_shape=jax.ShapeDtypeStruct((B_pad, 1), jnp.float32),
        grid_spec=pltpu.PrefetchScalarGridSpec(
            num_scalar_prefetch=0,
            grid=(grid,),
            in_specs=[
                pl.BlockSpec((tm, C), lambda i: (i, 0)),
                pl.BlockSpec((tm, C), lambda i: (i, 0)),
            ],
            out_specs=pl.BlockSpec((tm, 1), lambda i: (i, 0)),
        ),
        compiler_params=pltpu.CompilerParams(
            # no cross-iteration state -> batch tiles are independent; lets
            # v7x shard the grid across both TensorCores (neutral on v5e/v6e).
            dimension_semantics=("parallel",),
        ),
    )(pred, target)

    # Final cross-tile reduction + mean in the wrapper (pairwise sum; padded
    # rows are exactly zero, so summing everything is safe).
    return jnp.sum(row_losses) / jnp.float32(B)


if __name__ == "__main__":
    key = jax.random.PRNGKey(0)
    kp, kt = jax.random.split(key)

    B, C = 8, 32
    pred = jax.random.normal(kp, (B, C), dtype=jnp.float32)
    # soft target distribution (probability target), deterministic
    target = jax.nn.softmax(jax.random.normal(kt, (B, C), dtype=jnp.float32), axis=1)

    loss = are_loss(pred, target)
    jax.block_until_ready(loss)

    # reference in plain JAX (same math as the PyTorch module)
    ref = jnp.mean(jnp.sum(-target * jax.nn.log_softmax(pred, axis=1), axis=1))
    assert jnp.allclose(loss, ref, rtol=1e-5, atol=1e-5), (loss, ref)

    print("KERNEL_OK")
</pallas_src>

<mosaic_0001>
module attributes {stable_mosaic.version = 11 : i64} {
  func.func @_are_loss_kernel(%arg0: i32, %arg1: memref<8x32xf32, #tpu.memory_space<vmem>>, %arg2: memref<8x32xf32, #tpu.memory_space<vmem>>, %arg3: memref<8x1xf32, #tpu.memory_space<vmem>>) attributes {dimension_semantics = [#tpu.dimension_semantics<parallel>], iteration_bounds = array<i64: 1>, scalar_prefetch = 0 : i64, scratch_operands = 0 : i64, tpu.core_type = #tpu.core_type<tc>, window_params = [{transform_indices = @transform_0, window_bounds = array<i64: 8, 32>}, {transform_indices = @transform_1, window_bounds = array<i64: 8, 32>}, {transform_indices = @transform_2, window_bounds = array<i64: 8, 1>}]} {
    %c0 = arith.constant 0 : index
    %c0_0 = arith.constant 0 : index
    %0 = vector.load %arg1[%c0, %c0_0] : memref<8x32xf32, #tpu.memory_space<vmem>>, vector<8x32xf32>
    %c0_1 = arith.constant 0 : index
    %c0_2 = arith.constant 0 : index
    %1 = vector.load %arg2[%c0_1, %c0_2] : memref<8x32xf32, #tpu.memory_space<vmem>>, vector<8x32xf32>
    %cst = arith.constant dense<0xFF800000> : vector<8xf32>
    %2 = vector.multi_reduction <maximumf>, %0, %cst [1] : vector<8x32xf32> to vector<8xf32>
    %3 = vector.shape_cast %2 : vector<8xf32> to vector<8x1xf32>
    %4 = vector.broadcast %3 : vector<8x1xf32> to vector<8x32xf32>
    %5 = arith.subf %0, %4 : vector<8x32xf32>
    %6 = math.exp %5 : vector<8x32xf32>
    %cst_3 = arith.constant dense<0.000000e+00> : vector<8xf32>
    %7 = vector.multi_reduction <add>, %6, %cst_3 [1] : vector<8x32xf32> to vector<8xf32>
    %8 = vector.shape_cast %7 : vector<8xf32> to vector<8x1xf32>
    %9 = math.log %8 : vector<8x1xf32>
    %10 = vector.broadcast %9 : vector<8x1xf32> to vector<8x32xf32>
    %11 = arith.subf %5, %10 : vector<8x32xf32>
    %cst_4 = arith.constant 0.000000e+00 : f32
    %12 = vector.broadcast %cst_4 : f32 to vector<8x32xf32>
    %13 = arith.subf %12, %1 : vector<8x32xf32>
    %14 = arith.mulf %13, %11 : vector<8x32xf32>
    %cst_5 = arith.constant dense<0.000000e+00> : vector<8xf32>
    %15 = vector.multi_reduction <add>, %14, %cst_5 [1] : vector<8x32xf32> to vector<8xf32>
    %16 = vector.shape_cast %15 : vector<8xf32> to vector<8x1xf32>
    %c0_6 = arith.constant 0 : index
    %c0_7 = arith.constant 0 : index
    %17 = vector.load %arg3[%c0_6, %c0_7] : memref<8x1xf32, #tpu.memory_space<vmem>>, vector<8x1xf32>
    tpu.vector_store %arg3[%c0_6, %c0_7], %16 {strides = array<i32>} : memref<8x1xf32, #tpu.memory_space<vmem>>, vector<8x1xf32>,
    return
  }
  func.func @transform_0(%arg0: i32) -> (i32, i32) {
    %c0_i32 = arith.constant 0 : i32
    %c0_i32_0 = arith.constant 0 : i32
    return %arg0, %c0_i32 : i32, i32
  }
  func.func @transform_1(%arg0: i32) -> (i32, i32) {
    %c0_i32 = arith.constant 0 : i32
    %c0_i32_0 = arith.constant 0 : i32
    return %arg0, %c0_i32 : i32, i32
  }
  func.func @transform_2(%arg0: i32) -> (i32, i32) {
    %c0_i32 = arith.constant 0 : i32
    %c0_i32_0 = arith.constant 0 : i32
    return %arg0, %c0_i32 : i32, i32
  }
}

</mosaic_0001>

<bundles_post_ra>
// kernel: tpu_custom_call.1
= control target key start
LH: loop header
LB: loop body
LE: loop exit
PB: predicated region body
PF: predicated region fallthrough
CT: control target
= control target key end

     0   :  { %7 = vsyncpa [#allocation3], 0  ;;  %s164_s0 = inlined_call_operand.hbm [shape: f32[8,32], index: 0, kind: input, shape index: {}]   ;;  %s165_s1 = inlined_call_operand.hbm [shape: f32[8,32], index: 1, kind: input, shape index: {}]   ;;  %s166_s2 = inlined_call_operand.vmem [shape: f32[8,1], index: 2, kind: output, shape index: {}]  }
   0x1   :  { %8 = vsyncpa [#allocation5], 0  ;;  %s117_s9 = smov [#allocation2]   ;;  %s118_s11 = smov [#allocation4]  }
   0x2   :  { %s15_s10 = sshll.u32 %s117_s9, 4  ;;  %s25_s12 = sshll.u32 %s118_s11, 4  ;;  %s16_s10 = int_to_ptr.vmem [resolvable:$true] %s15_s10  ;;  %s26_s12 = int_to_ptr.vmem [resolvable:$true] %s25_s12 }
   0x3   :  { %s69_s15 = scalar_lea.hbm %s164_s0, 128 }
   0x4   :  { %p70_p0 = scmp.ne.s32.totalorder %s164_s0, %s69_s15  ;;  %p73_p1 = scmp.lt.u32.totalorder %s69_s15, %s164_s0 }
   0x6   :  { %p75_p2 = pnand %p73_p1, %p70_p0 }
   0x8   :  { %78 = shalt.err (!%p75_p2)
}
   0x9   :  { %s79_s20 = scalar_lea.vmem %s16_s10, 128  ;;  %p84_p4 = scmp.lt.s32.totalorder %s16_s10, %s16_s10 }
   0xa   :  { %p80_p3 = scmp.ne.s32.totalorder %s16_s10, %s79_s20  ;;  %p85_p5 = scmp.lt.s32.totalorder %s79_s20, %s79_s20 }
   0xc   :  { %p86_p6 = por %p85_p5, %p84_p4 }
   0xe   :  { %p87_p7 = pnand %p86_p6, %p80_p3 }
  0x10   :  { %90 = shalt.err (!%p87_p7)
}
  0x11   :  { %18 = dma.hbm_to_vmem [thread:$0]  %s164_s0, 128, %s16_s10, [#allocation3]  }
  0x12   :  { %s91_s25 = scalar_lea.hbm %s165_s1, 128 }
  0x13   :  { %p92_p8 = scmp.ne.s32.totalorder %s165_s1, %s91_s25  ;;  %p95_p9 = scmp.lt.u32.totalorder %s91_s25, %s165_s1 }
  0x15   :  { %p97_p10 = pnand %p95_p9, %p92_p8 }
  0x17   :  { %100 = shalt.err (!%p97_p10)
}
  0x18   :  { %s101_s30 = scalar_lea.vmem %s26_s12, 128  ;;  %p106_p12 = scmp.lt.s32.totalorder %s26_s12, %s26_s12 }
  0x19   :  { %p102_p11 = scmp.ne.s32.totalorder %s26_s12, %s101_s30  ;;  %p107_p13 = scmp.lt.s32.totalorder %s101_s30, %s101_s30 }
  0x1b   :  { %p108_p0 = por %p107_p13, %p106_p12 }
  0x1d   :  { %p109_p1 = pnand %p108_p0, %p102_p11 }
  0x1f   :  { %112 = shalt.err (!%p109_p1)
}
  0x20   :  { %28 = dma.hbm_to_vmem [thread:$0]  %s165_s1, 128, %s26_s12, [#allocation5]  }
  0x21   :  { %113 = dma.done.wait [#allocation3], 128  }
  0x22   :  { %114 = vsyncadd [#allocation3], 4294967168 }
  0x23   :  { %115 = dma.done.wait [#allocation5], 128  }
  0x24   :  { %116 = vsyncadd [#allocation5], 4294967168  ;;  %vm37_vm0 = vcmask 261120   ;;  %v35_v0 = vld [vmem:[#allocation2] sm:$0xff]  ;;  %v36_v8 = vld [vmem:[#allocation4] sm:$0xff]  ;;  %vm55_vm1 = vcmask 7168  }
  0x25   :  { %v38_v1 = vsel %vm37_vm0, %v35_v0, -inf  ;;  %v50_v11 = vsub.f32 0.0, %v36_v8 }
  0x26   :  { %39 = vmax.xlane.f32.xlu0 %v38_v1 }
  0xb3   :  { %v40_v2 = vpop.xlane.xlu0 %39 }
  0xb4   :  { %v41_v3 = vsub.f32 %v35_v0, %v40_v2 }
  0xb6   :  { %v42_v4 = vmul.f32 1.442695, %v41_v3 }
  0xb8   :  { %65 = vpow2.f32 %v42_v4 }
  0xc2   :  { %v66_v5 = vpop.eup %65 }
  0xc3   :  { %v44_v6 = vsel %vm37_vm0, %v66_v5, 0.0 }
  0xc4   :  { %45 = vadd.xlane.f32.xlu0 %v44_v6 }
 0x151   :  { %v46_v7 = vpop.xlane.xlu0 %45 }
 0x152   :  { %67 = vlog2.f32 %v46_v7 }
 0x15c   :  { %v68_v9 = vpop.eup %67 }
 0x15d   :  { %v48_v10 = vmul.f32 0.6931472, %v68_v9 }
 0x15f   :  { %v49_v12 = vsub.f32 %v41_v3, %v48_v10 }
 0x161   :  { %v51_v13 = vmul.f32 %v50_v11, %v49_v12 }
 0x163   :  { %v52_v14 = vsel %vm37_vm0, %v51_v13, 0.0 }
 0x164   :  { %53 = vadd.xlane.f32.xlu1 %v52_v14 }
 0x1f1   :  { %v54_v15 = vpop.xlane.xlu1 %53 }
 0x1f2   :  { %56 = vst.msk [vmem:[%s166_s2] sm:$0xff] %vm55_vm1, %v54_v15 }
 0x1f3   :  { %61 = vsyncpa [#allocation3], 1 }
 0x1f4   :  { %62 = vsyncpa [#allocation5], 1 }

</bundles_post_ra>
